<compile_context>
chip_gen: v6e
topology: v6e:2x2x1
jax: 0.10.0
libtpu: 0.0.40
codegen_flags: <defaults>
</compile_context>

<pallas_src>
import functools

import numpy as np

import jax
import jax.numpy as jnp
from jax.experimental import pallas as pl
from jax.experimental.pallas import tpu as pltpu

LOGSCALE_FACTOR = 3.0


def _round_up(x, m):
    return ((x + m - 1) // m) * m


def _cdiv(a, b):
    return -(-a // b)


# ---------------------------------------------------------------------------
# Kernels
# ---------------------------------------------------------------------------
def fc_actnorm_kernel_accout(x_ref, w_ref, scale_ref, bsc_ref, o_ref):
    """out_dtype == f32: accumulate directly into the resident output tile."""
    k = pl.program_id(2)

    @pl.when(k == 0)
    def _():
        o_ref[...] = jnp.zeros_like(o_ref)

    o_ref[...] += jnp.dot(
        x_ref[...], w_ref[...], preferred_element_type=jnp.float32
    )

    # (x@w + b) * exp(logs*3) == acc*scale + b*scale  (scale / b*scale hoisted)
    @pl.when(k == pl.num_programs(2) - 1)
    def _():
        o_ref[...] = o_ref[...] * scale_ref[...] + bsc_ref[...]


def fc_actnorm_kernel_scratch(x_ref, w_ref, scale_ref, bsc_ref, o_ref, acc_ref):
    """Narrow out_dtype (e.g. bf16 writeback): f32 VMEM accumulator + cast."""
    k = pl.program_id(2)

    @pl.when(k == 0)
    def _():
        acc_ref[...] = jnp.zeros_like(acc_ref)

    acc_ref[...] += jnp.dot(
        x_ref[...], w_ref[...], preferred_element_type=jnp.float32
    )

    @pl.when(k == pl.num_programs(2) - 1)
    def _():
        o_ref[...] = (
            acc_ref[...] * scale_ref[...] + bsc_ref[...]
        ).astype(o_ref.dtype)


# ---------------------------------------------------------------------------
# Tile selection
# ---------------------------------------------------------------------------
def _pick_tiles(B, K, N, sublane, max_tm=512, max_tn=1024, max_tk=1024):
    # tm: avoid M-padding blowup (e.g. B=264 must not become Mp=512).
    if B <= max_tm:
        tm = _round_up(B, sublane)
    else:
        n_m_blocks = _cdiv(B, 256)
        tm = _round_up(_cdiv(B, n_m_blocks), sublane)
    Mp = _round_up(B, tm)
    m_blocks = Mp // tm

    tk = min(max_tk, _round_up(K, 128))
    tn = min(max_tn, _round_up(N, 128))

    # v7x megacore: if there is only one M block, keep >= 2 blocks along the
    # (parallel) N axis so both TensorCores get work.  Only when it does not
    # introduce noticeable N padding (harmless on single-TC v5e/v6e).
    n128 = _cdiv(N, 128)
    if m_blocks == 1 and n128 >= 2 and (n128 % 2 == 0 or n128 >= 8):
        tn = min(tn, 128 * _cdiv(n128, 2))

    return tm, tn, tk


# ---------------------------------------------------------------------------
# Forward wrapper
# ---------------------------------------------------------------------------
@functools.partial(
    jax.jit, static_argnames=("compute_dtype", "out_dtype", "max_tn", "max_tk")
)
def fc_forward(
    x,
    w,
    an_bias,
    an_logs,
    *,
    compute_dtype=jnp.bfloat16,   # MXU feed dtype; None -> keep f32 operands
    out_dtype=jnp.float32,        # bf16 halves writeback bytes (v7x) if allowed
    max_tn=1024,
    max_tk=1024,
):
    """Pallas implementation of fc.forward(x, do_actnorm=True, init=False)."""
    B, K = x.shape
    Kw, N = w.shape
    assert K == Kw

    # Hoist actnorm parameter math out of the kernel (one-time, f32).
    scale = jnp.exp(an_logs.astype(jnp.float32) * LOGSCALE_FACTOR)   # (1, N)
    b_scaled = an_bias.astype(jnp.float32) * scale                    # (1, N)

    if compute_dtype is not None:
        x = x.astype(compute_dtype)
        w = w.astype(compute_dtype)
    feed_dtype = x.dtype
    sublane = 16 if jnp.dtype(feed_dtype) == jnp.dtype(jnp.bfloat16) else 8

    tm, tn, tk = _pick_tiles(B, K, N, sublane, max_tn=max_tn, max_tk=max_tk)
    Mp = _round_up(B, tm)
    Kp = _round_up(K, tk)
    Np = _round_up(N, tn)

    # Zero-pad to tile multiples (K zeros keep the reduction exact); fast path
    # skips padding entirely when already aligned.
    if (Mp, Kp) != (B, K):
        x = jnp.pad(x, ((0, Mp - B), (0, Kp - K)))
    if (Kp, Np) != (K, N):
        w = jnp.pad(w, ((0, Kp - K), (0, Np - N)))
    if Np != N:
        scale = jnp.pad(scale, ((0, 0), (0, Np - N)))
        b_scaled = jnp.pad(b_scaled, ((0, 0), (0, Np - N)))

    grid = (Mp // tm, Np // tn, Kp // tk)   # reduction axis (K) last

    # Triple-buffer the big streamed operand when the K pipeline is deep enough.
    if grid[2] >= 3:
        w_spec = pl.BlockSpec(
            (tk, tn), lambda i, j, k: (k, j), pipeline_mode=pl.Buffered(3)
        )
    else:
        w_spec = pl.BlockSpec((tk, tn), lambda i, j, k: (k, j))

    accumulate_in_out = np.dtype(out_dtype) == np.dtype(np.float32)
    if accumulate_in_out:
        kernel = fc_actnorm_kernel_accout
        scratch_shapes = []
    else:
        kernel = fc_actnorm_kernel_scratch
        scratch_shapes = [pltpu.VMEM((tm, tn), jnp.float32)]

    feed_bytes = jnp.dtype(feed_dtype).itemsize
    out_bytes = np.dtype(out_dtype).itemsize
    cost = pl.CostEstimate(
        flops=2 * Mp * Np * Kp,
        transcendentals=0,
        bytes_accessed=(Mp * Kp + Kp * Np) * feed_bytes + Mp * Np * out_bytes,
    )

    out = pl.pallas_call(
        kernel,
        out_shape=jax.ShapeDtypeStruct((Mp, Np), out_dtype),
        grid_spec=pltpu.PrefetchScalarGridSpec(
            num_scalar_prefetch=0,
            grid=grid,
            in_specs=[
                pl.BlockSpec((tm, tk), lambda i, j, k: (i, k)),   # x
                w_spec,                                           # w
                pl.BlockSpec((1, tn), lambda i, j, k: (0, j)),    # scale
                pl.BlockSpec((1, tn), lambda i, j, k: (0, j)),    # b * scale
            ],
            out_specs=pl.BlockSpec((tm, tn), lambda i, j, k: (i, j)),
            scratch_shapes=scratch_shapes,
        ),
        compiler_params=pltpu.CompilerParams(
            dimension_semantics=("parallel", "parallel", "arbitrary"),
            vmem_limit_bytes=48 * 1024 * 1024,
        ),
        cost_estimate=cost,
    )(x, w, scale, b_scaled)

    if (Mp, Np) != (B, N):
        out = out[:B, :N]
    return out


def fc_forward_ref(x, w, an_bias, an_logs):
    """Pure-JAX reference matching the PyTorch semantics."""
    y = jnp.dot(x, w, preferred_element_type=jnp.float32)
    y = y + an_bias
    y = y * jnp.exp(an_logs * LOGSCALE_FACTOR)
    return y


if __name__ == "__main__":
    key = jax.random.PRNGKey(0)

    # ---- Small test (shapes consistent with the module: B=8, n_in=32, width=128)
    B, N_IN, WIDTH = 8, 32, 128
    kx, kw, kb, kl = jax.random.split(key, 4)
    x = jax.random.normal(kx, (B, N_IN), dtype=jnp.float32)
    # Parameter init mirroring the module's __init__:
    #   fc.w = randn(n_in,width)*0.05 ; actnorm.b, actnorm.logs = randn(1,width)*0.05
    w = jax.random.normal(kw, (N_IN, WIDTH), dtype=jnp.float32) * 0.05
    an_bias = jax.random.normal(kb, (1, WIDTH), dtype=jnp.float32) * 0.05
    an_logs = jax.random.normal(kl, (1, WIDTH), dtype=jnp.float32) * 0.05

    ref = fc_forward_ref(x, w, an_bias, an_logs)

    # (a) f32 MXU feed -> strict tolerance.
    out_f32 = jax.block_until_ready(
        fc_forward(x, w, an_bias, an_logs, compute_dtype=None)
    )
    assert out_f32.shape == (B, WIDTH)
    assert jnp.allclose(out_f32, ref, atol=1e-5, rtol=1e-5), "mismatch (small, f32)"

    # (b) default bf16 MXU feed -> loose tolerance.
    out_bf16 = jax.block_until_ready(fc_forward(x, w, an_bias, an_logs))
    rel_err = jnp.max(jnp.abs(out_bf16 - ref)) / (jnp.max(jnp.abs(ref)) + 1e-6)
    assert rel_err < 3e-2, f"mismatch (small, bf16 feed): rel_err={rel_err}"

    # (c) bf16 output path (scratch-accumulator kernel).
    out_bf16o = jax.block_until_ready(
        fc_forward(x, w, an_bias, an_logs, out_dtype=jnp.bfloat16)
    )
    rel_err = jnp.max(jnp.abs(out_bf16o.astype(jnp.float32) - ref)) / (
        jnp.max(jnp.abs(ref)) + 1e-6
    )
    assert rel_err < 3e-2, f"mismatch (small, bf16 out): rel_err={rel_err}"

    # ---- Larger test exercising multi-tile grid: K accumulation over 3 blocks
    # ---- (triple-buffered w), 2 N blocks (v7x megacore rule), adaptive tm
    # ---- (B=264 -> Mp=272, not 512) and the M-padding path.
    B2, N_IN2, WIDTH2 = 264, 3072, 1024
    kx2, kw2, kb2, kl2 = jax.random.split(jax.random.PRNGKey(1), 4)
    x2 = jax.random.normal(kx2, (B2, N_IN2), dtype=jnp.float32)
    w2 = jax.random.normal(kw2, (N_IN2, WIDTH2), dtype=jnp.float32) * 0.05
    an_bias2 = jax.random.normal(kb2, (1, WIDTH2), dtype=jnp.float32) * 0.05
    an_logs2 = jax.random.normal(kl2, (1, WIDTH2), dtype=jnp.float32) * 0.05

    out2 = jax.block_until_ready(fc_forward(x2, w2, an_bias2, an_logs2))
    ref2 = fc_forward_ref(x2, w2, an_bias2, an_logs2)
    assert out2.shape == (B2, WIDTH2)
    rel_err2 = jnp.max(jnp.abs(out2 - ref2)) / (jnp.max(jnp.abs(ref2)) + 1e-6)
    assert rel_err2 < 3e-2, f"mismatch (large, bf16 feed): rel_err={rel_err2}"

    print("KERNEL_OK")
</pallas_src>

<mosaic_0001>
module attributes {stable_mosaic.version = 11 : i64} {
  func.func @fc_actnorm_kernel_accout(%arg0: i32, %arg1: i32, %arg2: i32, %arg3: memref<8x128xf32, #tpu.memory_space<vmem>>, %arg4: memref<128x128xf32, #tpu.memory_space<vmem>>, %arg5: memref<1x128xf32, #tpu.memory_space<vmem>>, %arg6: memref<1x128xf32, #tpu.memory_space<vmem>>, %arg7: memref<8x128xf32, #tpu.memory_space<vmem>>) attributes {dimension_semantics = [#tpu.dimension_semantics<parallel>, #tpu.dimension_semantics<parallel>, #tpu.dimension_semantics<arbitrary>], iteration_bounds = array<i64: 1, 1, 1>, scalar_prefetch = 0 : i64, scratch_operands = 0 : i64, tpu.core_type = #tpu.core_type<tc>, window_params = [{transform_indices = @transform_0, window_bounds = array<i64: 8, 128>}, {transform_indices = @transform_1, window_bounds = array<i64: 128, 128>}, {transform_indices = @transform_2, window_bounds = array<i64: 1, 128>}, {transform_indices = @transform_3, window_bounds = array<i64: 1, 128>}, {transform_indices = @transform_4, window_bounds = array<i64: 8, 128>}]} {
    %c0_i32 = arith.constant 0 : i32
    %0 = arith.cmpi eq, %arg2, %c0_i32 : i32
    %1 = arith.extui %0 : i1 to i32
    %c0_i32_0 = arith.constant 0 : i32
    %2 = arith.cmpi ne, %1, %c0_i32_0 : i32
    scf.if %2 {
      %cst_10 = arith.constant 0.000000e+00 : f32
      %12 = vector.broadcast %cst_10 : f32 to vector<8x128xf32>
      %c0_11 = arith.constant 0 : index
      %c0_12 = arith.constant 0 : index
      %13 = vector.load %arg7[%c0_11, %c0_12] : memref<8x128xf32, #tpu.memory_space<vmem>>, vector<8x128xf32>
      tpu.vector_store %arg7[%c0_11, %c0_12], %12 {strides = array<i32>} : memref<8x128xf32, #tpu.memory_space<vmem>>, vector<8x128xf32>,
    } else {
    }
    %c0 = arith.constant 0 : index
    %c0_1 = arith.constant 0 : index
    %3 = vector.load %arg7[%c0, %c0_1] : memref<8x128xf32, #tpu.memory_space<vmem>>, vector<8x128xf32>
    %c0_2 = arith.constant 0 : index
    %c0_3 = arith.constant 0 : index
    %4 = vector.load %arg3[%c0_2, %c0_3] : memref<8x128xf32, #tpu.memory_space<vmem>>, vector<8x128xf32>
    %c0_4 = arith.constant 0 : index
    %c0_5 = arith.constant 0 : index
    %5 = vector.load %arg4[%c0_4, %c0_5] : memref<128x128xf32, #tpu.memory_space<vmem>>, vector<128x128xf32>
    %cst = arith.constant dense<0.000000e+00> : vector<8x128xf32>
    %6 = tpu.matmul %4, %5, %cst {dimension_numbers = #tpu.dot_dimension_numbers<[1], [0], [0], [1], [0, 0, 1, 1], [], []>} : vector<8x128xf32>, vector<128x128xf32>, vector<8x128xf32> -> vector<8x128xf32>
    %7 = arith.addf %3, %6 : vector<8x128xf32>
    %c0_6 = arith.constant 0 : index
    %c0_7 = arith.constant 0 : index
    %8 = vector.load %arg7[%c0_6, %c0_7] : memref<8x128xf32, #tpu.memory_space<vmem>>, vector<8x128xf32>
    tpu.vector_store %arg7[%c0_6, %c0_7], %7 {strides = array<i32>} : memref<8x128xf32, #tpu.memory_space<vmem>>, vector<8x128xf32>,
    %c0_i32_8 = arith.constant 0 : i32
    %9 = arith.cmpi eq, %arg2, %c0_i32_8 : i32
    %10 = arith.extui %9 : i1 to i32
    %c0_i32_9 = arith.constant 0 : i32
    %11 = arith.cmpi ne, %10, %c0_i32_9 : i32
    scf.if %11 {
      %c0_10 = arith.constant 0 : index
      %c0_11 = arith.constant 0 : index
      %12 = vector.load %arg7[%c0_10, %c0_11] : memref<8x128xf32, #tpu.memory_space<vmem>>, vector<8x128xf32>
      %c0_12 = arith.constant 0 : index
      %c0_13 = arith.constant 0 : index
      %13 = vector.load %arg5[%c0_12, %c0_13] : memref<1x128xf32, #tpu.memory_space<vmem>>, vector<1x128xf32>
      %14 = vector.broadcast %13 : vector<1x128xf32> to vector<8x128xf32>
      %15 = arith.mulf %12, %14 : vector<8x128xf32>
      %c0_14 = arith.constant 0 : index
      %c0_15 = arith.constant 0 : index
      %16 = vector.load %arg6[%c0_14, %c0_15] : memref<1x128xf32, #tpu.memory_space<vmem>>, vector<1x128xf32>
      %17 = vector.broadcast %16 : vector<1x128xf32> to vector<8x128xf32>
      %18 = arith.addf %15, %17 : vector<8x128xf32>
      %c0_16 = arith.constant 0 : index
      %c0_17 = arith.constant 0 : index
      %19 = vector.load %arg7[%c0_16, %c0_17] : memref<8x128xf32, #tpu.memory_space<vmem>>, vector<8x128xf32>
      tpu.vector_store %arg7[%c0_16, %c0_17], %18 {strides = array<i32>} : memref<8x128xf32, #tpu.memory_space<vmem>>, vector<8x128xf32>,
    } else {
    }
    return
  }
  func.func @transform_0(%arg0: i32, %arg1: i32, %arg2: i32) -> (i32, i32) {
    %c0_i32 = arith.constant 0 : i32
    return %arg0, %arg2 : i32, i32
  }
  func.func @transform_1(%arg0: i32, %arg1: i32, %arg2: i32) -> (i32, i32) {
    %c0_i32 = arith.constant 0 : i32
    return %arg2, %arg1 : i32, i32
  }
  func.func @transform_2(%arg0: i32, %arg1: i32, %arg2: i32) -> (i32, i32) {
    %c0_i32 = arith.constant 0 : i32
    %c0_i32_0 = arith.constant 0 : i32
    return %c0_i32, %arg1 : i32, i32
  }
  func.func @transform_3(%arg0: i32, %arg1: i32, %arg2: i32) -> (i32, i32) {
    %c0_i32 = arith.constant 0 : i32
    %c0_i32_0 = arith.constant 0 : i32
    return %c0_i32, %arg1 : i32, i32
  }
  func.func @transform_4(%arg0: i32, %arg1: i32, %arg2: i32) -> (i32, i32) {
    %c0_i32 = arith.constant 0 : i32
    return %arg0, %arg1 : i32, i32
  }
}

</mosaic_0001>

<bundles_post_ra>
// kernel: fc_forward.1
= control target key start
LH: loop header
LB: loop body
LE: loop exit
PB: predicated region body
PF: predicated region fallthrough
CT: control target
= control target key end

     0   :  { %v227_v1 = vmov 0.0   ;;  %vm228_vm0 = vmmov 0   ;;  %s315_s0 = inlined_call_operand.vmem [shape: f32[8,128], index: 0, kind: input, shape index: {}]   ;;  %s316_s1 = inlined_call_operand.vmem [shape: f32[128,128], index: 1, kind: input, shape index: {}]   ;;  %s317_s2 = inlined_call_operand.vmem [shape: f32[1,128], index: 2, kind: input, shape index: {}]   ;;  %s318_s3 = inlined_call_operand.vmem [shape: f32[1,128], index: 3, kind: input, shape index: {}]   ;;  %s319_s4 = inlined_call_operand.hbm [shape: f32[8,128], index: 4, kind: output, shape index: {}]  }
   0x1   :  { %v40_v0 = vld [vmem:[%s316_s1 + $0x78] sm:$0xff]  ;;  %167 = vmatprep.subr.mxu0 %v227_v1  ;;  %v39_v2 = vld [vmem:[%s316_s1 + $0x70] sm:$0xff]  ;;  %199 = vmatprep.mubr.msk.f32.mxu0 %vm228_vm0, %v227_v1  ;;  %v38_v3 = vld [vmem:[%s316_s1 + $0x68] sm:$0xff] }
   0x2   :  { %168 = vmatpush3.msra.mxu0 %v40_v0  ;;  %v37_v4 = vld [vmem:[%s316_s1 + $0x60] sm:$0xff] }
   0x3   :  { %169 = vmatprep.subr.mxu0 %v227_v1 }
   0x4   :  { %170 = vmatpush3.msra.mxu0 %v39_v2 }
   0x5   :  { %171 = vmatprep.subr.mxu0 %v227_v1 }
   0x6   :  { %9 = vsyncpa [#allocation3], 0  ;;  %172 = vmatpush3.msra.mxu0 %v38_v3  ;;  %v36_v5 = vld [vmem:[%s316_s1 + $0x58] sm:$0xff]  ;;  %v35_v6 = vld [vmem:[%s316_s1 + $0x50] sm:$0xff]  ;;  %s229_s27 = smov [#allocation2]  }
   0x7   :  { %173 = vmatprep.subr.mxu0 %v227_v1  ;;  %v34_v7 = vld [vmem:[%s316_s1 + $0x48] sm:$0xff]  ;;  %v33_v8 = vld [vmem:[%s316_s1 + $0x40] sm:$0xff]  ;;  %v32_v9 = vld [vmem:[%s316_s1 + $0x38] sm:$0xff] }
   0x8   :  { %174 = vmatpush3.msra.mxu0 %v37_v4  ;;  %v31_v10 = vld [vmem:[%s316_s1 + $0x30] sm:$0xff]  ;;  %v30_v11 = vld [vmem:[%s316_s1 + $0x28] sm:$0xff]  ;;  %v29_v12 = vld [vmem:[%s316_s1 + $0x20] sm:$0xff] }
   0x9   :  { %175 = vmatprep.subr.mxu0 %v227_v1  ;;  %v28_v13 = vld [vmem:[%s316_s1 + $0x18] sm:$0xff]  ;;  %v27_v14 = vld [vmem:[%s316_s1 + $0x10] sm:$0xff]  ;;  %v26_v15 = vld [vmem:[%s316_s1 + $0x8] sm:$0xff] }
   0xa   :  { %176 = vmatpush3.msra.mxu0 %v36_v5  ;;  %v25_v16 = vld [vmem:[%s316_s1] sm:$0xff]  ;;  %s140_s1 = sshll.u32 %s229_s27, 4  ;;  %s141_s1 = int_to_ptr.vmem [resolvable:$true] %s140_s1 }
   0xb   :  { %177 = vmatprep.subr.mxu0 %v227_v1  ;;  %v24_v17 = vld [vmem:[%s315_s0] sm:$0xff]  ;;  %s205_s0 = scalar_lea.vmem %s141_s1, 128  ;;  %p210_p1 = scmp.lt.s32.totalorder %s141_s1, %s141_s1 }
   0xc   :  { %178 = vmatpush3.msra.mxu0 %v35_v6  ;;  %v148_v19 = vld [vmem:[%s317_s2] ss:$0 sm:$0xff]  ;;  %p206_p0 = scmp.ne.s32.totalorder %s141_s1, %s205_s0  ;;  %p211_p2 = scmp.lt.s32.totalorder %s205_s0, %s205_s0 }
   0xd   :  { %179 = vmatprep.subr.mxu0 %v227_v1  ;;  %v149_v21 = vld [vmem:[%s318_s3] ss:$0 sm:$0xff] }
   0xe   :  { %180 = vmatpush3.msra.mxu0 %v34_v7  ;;  %p212_p3 = por %p211_p2, %p210_p1 }
   0xf   :  { %181 = vmatprep.subr.mxu0 %v227_v1 }
  0x10   :  { %182 = vmatpush3.msra.mxu0 %v33_v8  ;;  %p213_p4 = pnand %p212_p3, %p206_p0 }
  0x11   :  { %183 = vmatprep.subr.mxu0 %v227_v1 }
  0x12   :  { %184 = vmatpush3.msra.mxu0 %v32_v9 }
  0x13   :  { %185 = vmatprep.subr.mxu0 %v227_v1 }
  0x14   :  { %186 = vmatpush3.msra.mxu0 %v31_v10 }
  0x15   :  { %187 = vmatprep.subr.mxu0 %v227_v1 }
  0x16   :  { %188 = vmatpush3.msra.mxu0 %v30_v11 }
  0x17   :  { %189 = vmatprep.subr.mxu0 %v227_v1 }
  0x18   :  { %190 = vmatpush3.msra.mxu0 %v29_v12 }
  0x19   :  { %191 = vmatprep.subr.mxu0 %v227_v1 }
  0x1a   :  { %192 = vmatpush3.msra.mxu0 %v28_v13 }
  0x1b   :  { %193 = vmatprep.subr.mxu0 %v227_v1 }
  0x1c   :  { %194 = vmatpush3.msra.mxu0 %v27_v14 }
  0x1d   :  { %195 = vmatprep.subr.mxu0 %v227_v1 }
  0x1e   :  { %196 = vmatpush3.msra.mxu0 %v26_v15 }
  0x1f   :  { %197 = vmatprep.subr.mxu0 %v227_v1 }
  0x20   :  { %198 = vmatpush3.msra.mxu0 %v25_v16 }
  0x21   :  { %200 = vmatmul.mubr.f32.vlgmr.msra.gmra.mxu0 %v24_v17 }
  0xe1   :  { %v107_v18 = vpop.f32.mrf.mxu0 }
  0xe2   :  { %v124_v22 = vmul.f32 %v148_v19, %v107_v18 }
  0xe3   :  { %v201_v20 = vpop.f32.mrf.mxu0 }
  0xe4   :  { %v132_v23 = vadd.f32 %v149_v21, %v124_v22 }
  0xe6   :  { %133 = vst [vmem:[#allocation2] sm:$0xff] %v132_v23 }
  0xe7   :  { %216 = shalt.err (!%p213_p4)
}
  0xe8   :  { %143 = dma.vmem_to_hbm [thread:$0]  %s141_s1, 128, %s319_s4, [#allocation3]  }
  0xe9   :  { %225 = dma.done.wait [#allocation3], 128  }
  0xea   :  { %226 = vsyncadd [#allocation3], 4294967168 }
  0xeb   :  { %147 = vsyncpa [#allocation3], 1 }

</bundles_post_ra>
